<compile_context>
chip_gen: v5e
topology: v5e:2x2
jax: 0.10.0
libtpu: 0.0.40
codegen_flags: <defaults>
</compile_context>

<pallas_src>
import functools
import math

import jax
import jax.numpy as jnp
from jax.experimental import pallas as pl
from jax.experimental.pallas import tpu as pltpu

_NEG_LOG2E = -math.log2(math.e)
_HK_MAX = 512              # hidden-dim chunk size inside the kernel
_VMEM_BUDGET = 36 << 20    # per-step VMEM footprint target (fits v7x 64 MiB TC)
_VMEM_LIMIT = 48 << 20     # scoped VMEM limit handed to Mosaic (safe v5e..v7x)


def _round_up(a, m):
    return (a + m - 1) // m * m


def _mine_mlp_kernel(x_ref, y_ref, ys_ref, w1x_ref, w1y_ref, b1_ref, w2_ref,
                     out_ref, *, n_chunks, h_chunk, compute_dtype):
    """One batch tile: logits for the joint (x,y) and marginal (x,y_shuf) rows."""
    f32 = jnp.float32
    # Activations are read in their HBM dtype and (optionally) cast here, so the
    # wrapper never makes an extra pad/cast pass over x / y / y_shuf.
    x = x_ref[...].astype(compute_dtype)
    y = y_ref[...].astype(compute_dtype)
    ys = ys_ref[...].astype(compute_dtype)

    def chunk_logits(h0):
        w1x = w1x_ref[:, pl.ds(h0, h_chunk)]
        w1y = w1y_ref[:, pl.ds(h0, h_chunk)]
        b1 = b1_ref[:, pl.ds(h0, h_chunk)]          # (1, HK)  f32
        w2 = w2_ref[pl.ds(h0, h_chunk), :]          # (HK, 1)  f32
        # MXU matmuls, f32 accumulation.  x@W1x is shared by both streams.
        xw = jnp.dot(x, w1x, preferred_element_type=f32)     # (TB, HK)
        yw = jnp.dot(y, w1y, preferred_element_type=f32)     # (TB, HK)
        ysw = jnp.dot(ys, w1y, preferred_element_type=f32)   # (TB, HK)
        xb = xw + b1                                # shared bias add, hoisted
        h_joint = jnp.maximum(xb + yw, 0.0)
        h_marg = jnp.maximum(xb + ysw, 0.0)
        # fc2 (output width 1) on the MXU; it has idle slack in this
        # memory-bound kernel, relieving the VPU/XLU lane reduction.
        lj = jnp.dot(h_joint, w2, preferred_element_type=f32)   # (TB, 1)
        lm = jnp.dot(h_marg, w2, preferred_element_type=f32)    # (TB, 1)
        return lj, lm

    if n_chunks == 1:
        lj, lm = chunk_logits(0)
    else:
        # Chunk the hidden dim so live f32 temporaries stay ~6*TB*HK*4B instead
        # of ~6*TB*H*4B (keeps large batch tiles inside VMEM on every gen).
        tb = x.shape[0]
        zeros = jnp.zeros((tb, 1), f32)

        def body(c, carry):
            lj_acc, lm_acc = carry
            h0 = pl.multiple_of(c * h_chunk, h_chunk)
            dlj, dlm = chunk_logits(h0)
            return lj_acc + dlj, lm_acc + dlm

        lj, lm = jax.lax.fori_loop(0, n_chunks, body, (zeros, zeros),
                                   unroll=True)

    # Single merged (TB, 2) output tile: one writeback DMA per grid step.
    out_ref[:, 0:1] = lj.astype(out_ref.dtype)
    out_ref[:, 1:2] = lm.astype(out_ref.dtype)


def _pick_block_rows(B, D, HK, Hp, act_itemsize, w_itemsize, block_rows):
    """Batch tile rows: multiple of 8, >=2 grid steps when possible, VMEM-safe."""
    if B <= 8:
        return B
    tb = min(block_rows, B)
    if B >= 16:                    # keep >=2 grid steps (v7x has 2 TCs / chip)
        tb = min(tb, -(-B // 2))
    tb = max(8, (tb // 8) * 8)

    def est(t):
        acts = 3 * 2 * t * D * act_itemsize                        # x/y/ys, 2 bufs
        weights = 2 * (2 * D * Hp * w_itemsize + 2 * Hp * 4)       # worst case
        temps = 6 * t * HK * 4                                     # xw/yw/ysw/xb/h*
        outs = 2 * t * 2 * 4
        return acts + weights + temps + outs

    while tb > 8 and est(tb) > _VMEM_BUDGET:
        tb = max(8, ((tb // 2) // 8) * 8)
    return tb


def mine_logits(x, y, y_shuf, w1, b1, w2, *, compute_dtype=None,
                block_rows=1024):
    """Pallas MLP: per-row logits (pred_xy, pred_x_y) before the fc2 bias.

    x, y, y_shuf : (B, D) ;  w1 : (2D, H) ;  b1 : (H,) ;  w2 : (H, 1) or (H,)
    Returns two (B,) float32 arrays.
    """
    B, D = x.shape
    H = w1.shape[1]
    assert w1.shape == (2 * D, H)
    assert y.shape == (B, D) and y_shuf.shape == (B, D)

    cdt = x.dtype if compute_dtype is None else compute_dtype

    # Hidden-dim chunking (only when H is large).  Weights are zero-padded to a
    # multiple of the chunk; padded hidden units contribute exact zeros
    # (relu(0 + 0) * 0) so the result is unchanged.
    if H <= _HK_MAX:
        HK, Hp = H, H
    else:
        HK = _HK_MAX
        Hp = _round_up(H, HK)
    n_chunks = Hp // HK

    w1x = w1[:D]
    w1y = w1[D:]
    b1v = jnp.reshape(b1, (-1,)).astype(jnp.float32)
    w2v = jnp.reshape(w2, (-1,)).astype(jnp.float32)
    if Hp != H:
        w1x = jnp.pad(w1x, ((0, 0), (0, Hp - H)))
        w1y = jnp.pad(w1y, ((0, 0), (0, Hp - H)))
        b1v = jnp.pad(b1v, (0, Hp - H))
        w2v = jnp.pad(w2v, (0, Hp - H))
    # Only the tiny VMEM-resident first-layer weights are cast in the wrapper;
    # activations are cast (if at all) inside the kernel — no extra HBM pass.
    w1x = w1x.astype(cdt)
    w1y = w1y.astype(cdt)
    b1m = b1v.reshape(1, Hp)
    w2m = w2v.reshape(Hp, 1)

    TB = _pick_block_rows(B, D, HK, Hp, x.dtype.itemsize,
                          w1x.dtype.itemsize, block_rows)
    grid = (pl.cdiv(B, TB),)

    kernel = functools.partial(_mine_mlp_kernel, n_chunks=n_chunks,
                               h_chunk=HK, compute_dtype=cdt)

    def build(single_buffer_weights):
        if single_buffer_weights:
            # Constant-index-map operands stay resident; single-buffering them
            # reclaims VMEM (matters on v7x's 64 MiB TC / v5e's scoped limit).
            def wspec(shape):
                return pl.BlockSpec(shape, lambda i: (0, 0),
                                    pipeline_mode=pl.Buffered(1))
        else:
            def wspec(shape):
                return pl.BlockSpec(shape, lambda i: (0, 0))
        return pl.pallas_call(
            kernel,
            out_shape=jax.ShapeDtypeStruct((B, 2), jnp.float32),
            grid=grid,
            in_specs=[
                pl.BlockSpec((TB, D), lambda i: (i, 0)),   # x tile
                pl.BlockSpec((TB, D), lambda i: (i, 0)),   # y tile
                pl.BlockSpec((TB, D), lambda i: (i, 0)),   # y_shuf tile
                wspec((D, Hp)),                            # W1[:D]  (resident)
                wspec((D, Hp)),                            # W1[D:]  (resident)
                wspec((1, Hp)),                            # b1
                wspec((Hp, 1)),                            # w2 column
            ],
            out_specs=pl.BlockSpec((TB, 2), lambda i: (i, 0)),
            compiler_params=pltpu.CompilerParams(
                dimension_semantics=("parallel",),
                vmem_limit_bytes=_VMEM_LIMIT),
        )

    args = (x, y, y_shuf, w1x, w1y, b1m, w2m)
    try:
        out = build(True)(*args)
    except Exception:   # pl.Buffered(1) not supported on this jax/libtpu build
        out = build(False)(*args)
    return out[:, 0], out[:, 1]


def mine_loss(x, y, params, perm, *, mode="jsd", compute_dtype=None,
              block_rows=1024):
    """Full MINE.forward: permutation/gather + Pallas MLP + scalar objective."""
    assert mode in ("mine", "jsd")
    w1, b1, w2, b2 = params
    B = x.shape[0]

    # torch.randperm + y[idx]: a single JAX gather pass (no cast/pad passes
    # follow it any more).
    # TODO(synk): the gather could be removed entirely with a scalar-prefetched
    # block permutation + in-tile pltpu.roll, but that changes the exact
    # randperm pairing, so it is kept outside the kernel.
    y_shuf = y[perm]

    lj, lm = mine_logits(x, y, y_shuf, w1, b1, w2,
                         compute_dtype=compute_dtype, block_rows=block_rows)
    pred_xy = lj + b2        # scalar fc2 bias applied outside the kernel
    pred_x_y = lm + b2

    if mode == "mine":
        # log(mean(exp(z))) == logsumexp(z) - log(B)  (numerically safer)
        mi_loss = _NEG_LOG2E * (jnp.mean(pred_xy)
                                - (jax.nn.logsumexp(pred_x_y)
                                   - jnp.log(float(B))))
    else:  # 'jsd'
        mi_loss = -(-jnp.mean(jax.nn.softplus(-pred_xy))
                    - jnp.mean(jax.nn.softplus(pred_x_y)))
    return mi_loss


def mine_forward(x, y, params, key, *, mode="jsd", compute_dtype=None):
    """Mirrors MINE.forward: draws the random permutation internally."""
    perm = jax.random.permutation(key, x.shape[0])
    return mine_loss(x, y, params, perm, mode=mode, compute_dtype=compute_dtype)


def mine_loss_reference(x, y, params, perm, mode):
    """Plain-JAX replica of the PyTorch forward (high-precision dots)."""
    w1, b1, w2, b2 = params
    B = x.shape[0]
    hi = jax.lax.Precision.HIGHEST
    tiled_x = jnp.concatenate([x, x], axis=0)
    concat_y = jnp.concatenate([y, y[perm]], axis=0)
    inputs = jnp.concatenate([tiled_x, concat_y], axis=1)          # (2B, 2D)
    h = jnp.maximum(jnp.dot(inputs, w1, precision=hi) + b1, 0.0)
    logits = jnp.dot(h, w2.reshape(-1, 1), precision=hi) + b2      # (2B, 1)
    pred_xy, pred_x_y = logits[:B], logits[B:]
    if mode == "mine":
        return _NEG_LOG2E * (jnp.mean(pred_xy)
                             - jnp.log(jnp.mean(jnp.exp(pred_x_y))))
    return -(-jnp.mean(jax.nn.softplus(-pred_xy))
             - jnp.mean(jax.nn.softplus(pred_x_y)))


if __name__ == "__main__":
    root = jax.random.PRNGKey(0)

    def make_case(key, B, D, H):
        kx, ky, kp, kperm = jax.random.split(key, 4)
        x = jax.random.normal(kx, (B, D), jnp.float32)
        y = jax.random.normal(ky, (B, D), jnp.float32)
        # MINE.__init__ uses U(-0.1, 0.1) weights and zero biases; small
        # non-zero biases are used here so the bias paths are exercised.
        k1, k2, k3, k4 = jax.random.split(kp, 4)
        w1 = jax.random.uniform(k1, (2 * D, H), jnp.float32, -0.1, 0.1)
        b1 = jax.random.uniform(k2, (H,), jnp.float32, -0.01, 0.01)
        w2 = jax.random.uniform(k3, (H, 1), jnp.float32, -0.1, 0.1)
        b2 = jax.random.uniform(k4, (1,), jnp.float32, -0.01, 0.01)
        perm = jax.random.permutation(kperm, B)       # torch.randperm
        return x, y, (w1, b1, w2, b2), perm

    k_small, k_big = jax.random.split(root)
    cases = [
        # (name, case, also_test_bf16)
        ("small", make_case(k_small, 32, 16, 32), True),      # straight-line
        ("chunked", make_case(k_big, 200, 48, 1024), False),  # chunked H, ragged grid
    ]

    for name, (x, y, params, perm), test_bf16 in cases:
        for mode in ("jsd", "mine"):
            ref = mine_loss_reference(x, y, params, perm, mode)

            got = mine_loss(x, y, params, perm, mode=mode)
            jax.block_until_ready(got)
            assert jnp.allclose(got, ref, atol=1e-3, rtol=1e-3), \
                (name, mode, "f32", float(got), float(ref))

            if test_bf16:
                got_bf16 = mine_loss(x, y, params, perm, mode=mode,
                                     compute_dtype=jnp.bfloat16)
                jax.block_until_ready(got_bf16)
                assert jnp.allclose(got_bf16, ref, atol=3e-2, rtol=3e-2), \
                    (name, mode, "bf16", float(got_bf16), float(ref))

    print("KERNEL_OK")
</pallas_src>

<mosaic_0001>
module attributes {stable_mosaic.version = 11 : i64} {
  func.func @_mine_mlp_kernel(%arg0: i32, %arg1: memref<16x16xf32, #tpu.memory_space<vmem>>, %arg2: memref<16x16xf32, #tpu.memory_space<vmem>>, %arg3: memref<16x16xf32, #tpu.memory_space<vmem>>, %arg4: memref<16x32xf32, #tpu.memory_space<vmem>>, %arg5: memref<16x32xf32, #tpu.memory_space<vmem>>, %arg6: memref<1x32xf32, #tpu.memory_space<vmem>>, %arg7: memref<32x1xf32, #tpu.memory_space<vmem>>, %arg8: memref<16x2xf32, #tpu.memory_space<vmem>>) attributes {dimension_semantics = [#tpu.dimension_semantics<parallel>], iteration_bounds = array<i64: 2>, scalar_prefetch = 0 : i64, scratch_operands = 0 : i64, tpu.core_type = #tpu.core_type<tc>, window_params = [{transform_indices = @transform_0, window_bounds = array<i64: 16, 16>}, {transform_indices = @transform_1, window_bounds = array<i64: 16, 16>}, {transform_indices = @transform_2, window_bounds = array<i64: 16, 16>}, {pipeline_mode = #tpu.pipeline_mode<synchronous>, transform_indices = @transform_3, window_bounds = array<i64: 16, 32>}, {pipeline_mode = #tpu.pipeline_mode<synchronous>, transform_indices = @transform_4, window_bounds = array<i64: 16, 32>}, {pipeline_mode = #tpu.pipeline_mode<synchronous>, transform_indices = @transform_5, window_bounds = array<i64: 1, 32>}, {pipeline_mode = #tpu.pipeline_mode<synchronous>, transform_indices = @transform_6, window_bounds = array<i64: 32, 1>}, {transform_indices = @transform_7, window_bounds = array<i64: 16, 2>}]} {
    %c0 = arith.constant 0 : index
    %c0_0 = arith.constant 0 : index
    %0 = vector.load %arg1[%c0, %c0_0] : memref<16x16xf32, #tpu.memory_space<vmem>>, vector<16x16xf32>
    %c0_1 = arith.constant 0 : index
    %c0_2 = arith.constant 0 : index
    %1 = vector.load %arg2[%c0_1, %c0_2] : memref<16x16xf32, #tpu.memory_space<vmem>>, vector<16x16xf32>
    %c0_3 = arith.constant 0 : index
    %c0_4 = arith.constant 0 : index
    %2 = vector.load %arg3[%c0_3, %c0_4] : memref<16x16xf32, #tpu.memory_space<vmem>>, vector<16x16xf32>
    %c0_5 = arith.constant 0 : index
    %c0_6 = arith.constant 0 : index
    %3 = vector.load %arg4[%c0_5, %c0_6] : memref<16x32xf32, #tpu.memory_space<vmem>>, vector<16x32xf32>
    %c0_7 = arith.constant 0 : index
    %c0_8 = arith.constant 0 : index
    %4 = vector.load %arg5[%c0_7, %c0_8] : memref<16x32xf32, #tpu.memory_space<vmem>>, vector<16x32xf32>
    %c0_9 = arith.constant 0 : index
    %c0_10 = arith.constant 0 : index
    %5 = vector.load %arg6[%c0_9, %c0_10] : memref<1x32xf32, #tpu.memory_space<vmem>>, vector<1x32xf32>
    %c0_11 = arith.constant 0 : index
    %c0_12 = arith.constant 0 : index
    %6 = vector.load %arg7[%c0_11, %c0_12] : memref<32x1xf32, #tpu.memory_space<vmem>>, vector<32x1xf32>
    %cst = arith.constant dense<0.000000e+00> : vector<16x32xf32>
    %7 = tpu.matmul %0, %3, %cst {dimension_numbers = #tpu.dot_dimension_numbers<[1], [0], [0], [1], [0, 0, 1, 1], [], []>} : vector<16x16xf32>, vector<16x32xf32>, vector<16x32xf32> -> vector<16x32xf32>
    %cst_13 = arith.constant dense<0.000000e+00> : vector<16x32xf32>
    %8 = tpu.matmul %1, %4, %cst_13 {dimension_numbers = #tpu.dot_dimension_numbers<[1], [0], [0], [1], [0, 0, 1, 1], [], []>} : vector<16x16xf32>, vector<16x32xf32>, vector<16x32xf32> -> vector<16x32xf32>
    %cst_14 = arith.constant dense<0.000000e+00> : vector<16x32xf32>
    %9 = tpu.matmul %2, %4, %cst_14 {dimension_numbers = #tpu.dot_dimension_numbers<[1], [0], [0], [1], [0, 0, 1, 1], [], []>} : vector<16x16xf32>, vector<16x32xf32>, vector<16x32xf32> -> vector<16x32xf32>
    %10 = vector.broadcast %5 : vector<1x32xf32> to vector<16x32xf32>
    %11 = arith.addf %7, %10 : vector<16x32xf32>
    %12 = arith.addf %11, %8 : vector<16x32xf32>
    %cst_15 = arith.constant 0.000000e+00 : f32
    %13 = vector.broadcast %cst_15 : f32 to vector<16x32xf32>
    %14 = arith.maximumf %12, %13 : vector<16x32xf32>
    %15 = arith.addf %11, %9 : vector<16x32xf32>
    %cst_16 = arith.constant 0.000000e+00 : f32
    %16 = vector.broadcast %cst_16 : f32 to vector<16x32xf32>
    %17 = arith.maximumf %15, %16 : vector<16x32xf32>
    %cst_17 = arith.constant dense<0.000000e+00> : vector<16x1xf32>
    %18 = tpu.matmul %14, %6, %cst_17 {dimension_numbers = #tpu.dot_dimension_numbers<[1], [0], [0], [1], [0, 0, 1, 1], [], []>} : vector<16x32xf32>, vector<32x1xf32>, vector<16x1xf32> -> vector<16x1xf32>
    %cst_18 = arith.constant dense<0.000000e+00> : vector<16x1xf32>
    %19 = tpu.matmul %17, %6, %cst_18 {dimension_numbers = #tpu.dot_dimension_numbers<[1], [0], [0], [1], [0, 0, 1, 1], [], []>} : vector<16x32xf32>, vector<32x1xf32>, vector<16x1xf32> -> vector<16x1xf32>
    %c0_19 = arith.constant 0 : index
    %c0_20 = arith.constant 0 : index
    %20 = vector.load %arg8[%c0_19, %c0_20] : memref<16x2xf32, #tpu.memory_space<vmem>>, vector<16x1xf32>
    tpu.vector_store %arg8[%c0_19, %c0_20], %18 {strides = array<i32>} : memref<16x2xf32, #tpu.memory_space<vmem>>, vector<16x1xf32>,
    %c0_21 = arith.constant 0 : index
    %c1 = arith.constant 1 : index
    %21 = vector.load %arg8[%c0_21, %c1] : memref<16x2xf32, #tpu.memory_space<vmem>>, vector<16x1xf32>
    tpu.vector_store %arg8[%c0_21, %c1], %19 {strides = array<i32>} : memref<16x2xf32, #tpu.memory_space<vmem>>, vector<16x1xf32>,
    return
  }
  func.func @transform_0(%arg0: i32) -> (i32, i32) {
    %c0_i32 = arith.constant 0 : i32
    %c0_i32_0 = arith.constant 0 : i32
    return %arg0, %c0_i32 : i32, i32
  }
  func.func @transform_1(%arg0: i32) -> (i32, i32) {
    %c0_i32 = arith.constant 0 : i32
    %c0_i32_0 = arith.constant 0 : i32
    return %arg0, %c0_i32 : i32, i32
  }
  func.func @transform_2(%arg0: i32) -> (i32, i32) {
    %c0_i32 = arith.constant 0 : i32
    %c0_i32_0 = arith.constant 0 : i32
    return %arg0, %c0_i32 : i32, i32
  }
  func.func @transform_3(%arg0: i32) -> (i32, i32) {
    %c0_i32 = arith.constant 0 : i32
    %c0_i32_0 = arith.constant 0 : i32
    %c0_i32_1 = arith.constant 0 : i32
    return %c0_i32, %c0_i32_0 : i32, i32
  }
  func.func @transform_4(%arg0: i32) -> (i32, i32) {
    %c0_i32 = arith.constant 0 : i32
    %c0_i32_0 = arith.constant 0 : i32
    %c0_i32_1 = arith.constant 0 : i32
    return %c0_i32, %c0_i32_0 : i32, i32
  }
  func.func @transform_5(%arg0: i32) -> (i32, i32) {
    %c0_i32 = arith.constant 0 : i32
    %c0_i32_0 = arith.constant 0 : i32
    %c0_i32_1 = arith.constant 0 : i32
    return %c0_i32, %c0_i32_0 : i32, i32
  }
  func.func @transform_6(%arg0: i32) -> (i32, i32) {
    %c0_i32 = arith.constant 0 : i32
    %c0_i32_0 = arith.constant 0 : i32
    %c0_i32_1 = arith.constant 0 : i32
    return %c0_i32, %c0_i32_0 : i32, i32
  }
  func.func @transform_7(%arg0: i32) -> (i32, i32) {
    %c0_i32 = arith.constant 0 : i32
    %c0_i32_0 = arith.constant 0 : i32
    return %arg0, %c0_i32 : i32, i32
  }
}

module attributes {stable_mosaic.version = 11 : i64} {
  func.func @_mine_mlp_kernel(%arg0: i32, %arg1: memref<16x16xf32, #tpu.memory_space<vmem>>, %arg2: memref<16x16xf32, #tpu.memory_space<vmem>>, %arg3: memref<16x16xf32, #tpu.memory_space<vmem>>, %arg4: memref<16x32xf32, #tpu.memory_space<vmem>>, %arg5: memref<16x32xf32, #tpu.memory_space<vmem>>, %arg6: memref<1x32xf32, #tpu.memory_space<vmem>>, %arg7: memref<32x1xf32, #tpu.memory_space<vmem>>, %arg8: memref<16x2xf32, #tpu.memory_space<vmem>>) attributes {dimension_semantics = [#tpu.dimension_semantics<parallel>], iteration_bounds = array<i64: 2>, scalar_prefetch = 0 : i64, scratch_operands = 0 : i64, tpu.core_type = #tpu.core_type<tc>, window_params = [{transform_indices = @transform_0, window_bounds = array<i64: 16, 16>}, {transform_indices = @transform_1, window_bounds = array<i64: 16, 16>}, {transform_indices = @transform_2, window_bounds = array<i64: 16, 16>}, {pipeline_mode = #tpu.pipeline_mode<synchronous>, transform_indices = @transform_3, window_bounds = array<i64: 16, 32>}, {pipeline_mode = #tpu.pipeline_mode<synchronous>, transform_indices = @transform_4, window_bounds = array<i64: 16, 32>}, {pipeline_mode = #tpu.pipeline_mode<synchronous>, transform_indices = @transform_5, window_bounds = array<i64: 1, 32>}, {pipeline_mode = #tpu.pipeline_mode<synchronous>, transform_indices = @transform_6, window_bounds = array<i64: 32, 1>}, {transform_indices = @transform_7, window_bounds = array<i64: 16, 2>}]} {
    %c0 = arith.constant 0 : index
    %c0_0 = arith.constant 0 : index
    %0 = vector.load %arg1[%c0, %c0_0] : memref<16x16xf32, #tpu.memory_space<vmem>>, vector<16x16xf32>
    %c0_1 = arith.constant 0 : index
    %c0_2 = arith.constant 0 : index
    %1 = vector.load %arg2[%c0_1, %c0_2] : memref<16x16xf32, #tpu.memory_space<vmem>>, vector<16x16xf32>
    %c0_3 = arith.constant 0 : index
    %c0_4 = arith.constant 0 : index
    %2 = vector.load %arg3[%c0_3, %c0_4] : memref<16x16xf32, #tpu.memory_space<vmem>>, vector<16x16xf32>
    %c0_5 = arith.constant 0 : index
    %c0_6 = arith.constant 0 : index
    %3 = vector.load %arg4[%c0_5, %c0_6] : memref<16x32xf32, #tpu.memory_space<vmem>>, vector<16x32xf32>
    %c0_7 = arith.constant 0 : index
    %c0_8 = arith.constant 0 : index
    %4 = vector.load %arg5[%c0_7, %c0_8] : memref<16x32xf32, #tpu.memory_space<vmem>>, vector<16x32xf32>
    %c0_9 = arith.constant 0 : index
    %c0_10 = arith.constant 0 : index
    %5 = vector.load %arg6[%c0_9, %c0_10] : memref<1x32xf32, #tpu.memory_space<vmem>>, vector<1x32xf32>
    %c0_11 = arith.constant 0 : index
    %c0_12 = arith.constant 0 : index
    %6 = vector.load %arg7[%c0_11, %c0_12] : memref<32x1xf32, #tpu.memory_space<vmem>>, vector<32x1xf32>
    %cst = arith.constant dense<0.000000e+00> : vector<16x32xf32>
    %7 = tpu.matmul %0, %3, %cst {dimension_numbers = #tpu.dot_dimension_numbers<[1], [0], [0], [1], [0, 0, 1, 1], [], []>} : vector<16x16xf32>, vector<16x32xf32>, vector<16x32xf32> -> vector<16x32xf32>
    %cst_13 = arith.constant dense<0.000000e+00> : vector<16x32xf32>
    %8 = tpu.matmul %1, %4, %cst_13 {dimension_numbers = #tpu.dot_dimension_numbers<[1], [0], [0], [1], [0, 0, 1, 1], [], []>} : vector<16x16xf32>, vector<16x32xf32>, vector<16x32xf32> -> vector<16x32xf32>
    %cst_14 = arith.constant dense<0.000000e+00> : vector<16x32xf32>
    %9 = tpu.matmul %2, %4, %cst_14 {dimension_numbers = #tpu.dot_dimension_numbers<[1], [0], [0], [1], [0, 0, 1, 1], [], []>} : vector<16x16xf32>, vector<16x32xf32>, vector<16x32xf32> -> vector<16x32xf32>
    %10 = vector.broadcast %5 : vector<1x32xf32> to vector<16x32xf32>
    %11 = arith.addf %7, %10 : vector<16x32xf32>
    %12 = arith.addf %11, %8 : vector<16x32xf32>
    %cst_15 = arith.constant 0.000000e+00 : f32
    %13 = vector.broadcast %cst_15 : f32 to vector<16x32xf32>
    %14 = arith.maximumf %12, %13 : vector<16x32xf32>
    %15 = arith.addf %11, %9 : vector<16x32xf32>
    %cst_16 = arith.constant 0.000000e+00 : f32
    %16 = vector.broadcast %cst_16 : f32 to vector<16x32xf32>
    %17 = arith.maximumf %15, %16 : vector<16x32xf32>
    %cst_17 = arith.constant dense<0.000000e+00> : vector<16x1xf32>
    %18 = tpu.matmul %14, %6, %cst_17 {dimension_numbers = #tpu.dot_dimension_numbers<[1], [0], [0], [1], [0, 0, 1, 1], [], []>} : vector<16x32xf32>, vector<32x1xf32>, vector<16x1xf32> -> vector<16x1xf32>
    %cst_18 = arith.constant dense<0.000000e+00> : vector<16x1xf32>
    %19 = tpu.matmul %17, %6, %cst_18 {dimension_numbers = #tpu.dot_dimension_numbers<[1], [0], [0], [1], [0, 0, 1, 1], [], []>} : vector<16x32xf32>, vector<32x1xf32>, vector<16x1xf32> -> vector<16x1xf32>
    %c0_19 = arith.constant 0 : index
    %c0_20 = arith.constant 0 : index
    %20 = vector.load %arg8[%c0_19, %c0_20] : memref<16x2xf32, #tpu.memory_space<vmem>>, vector<16x1xf32>
    tpu.vector_store %arg8[%c0_19, %c0_20], %18 {strides = array<i32>} : memref<16x2xf32, #tpu.memory_space<vmem>>, vector<16x1xf32>,
    %c0_21 = arith.constant 0 : index
    %c1 = arith.constant 1 : index
    %21 = vector.load %arg8[%c0_21, %c1] : memref<16x2xf32, #tpu.memory_space<vmem>>, vector<16x1xf32>
    tpu.vector_store %arg8[%c0_21, %c1], %19 {strides = array<i32>} : memref<16x2xf32, #tpu.memory_space<vmem>>, vector<16x1xf32>,
    return
  }
  func.func @transform_0(%arg0: i32) -> (i32, i32) {
    %c0_i32 = arith.constant 0 : i32
    %c0_i32_0 = arith.constant 0 : i32
    return %arg0, %c0_i32 : i32, i32
  }
  func.func @transform_1(%arg0: i32) -> (i32, i32) {
    %c0_i32 = arith.constant 0 : i32
    %c0_i32_0 = arith.constant 0 : i32
    return %arg0, %c0_i32 : i32, i32
  }
  func.func @transform_2(%arg0: i32) -> (i32, i32) {
    %c0_i32 = arith.constant 0 : i32
    %c0_i32_0 = arith.constant 0 : i32
    return %arg0, %c0_i32 : i32, i32
  }
  func.func @transform_3(%arg0: i32) -> (i32, i32) {
    %c0_i32 = arith.constant 0 : i32
    %c0_i32_0 = arith.constant 0 : i32
    %c0_i32_1 = arith.constant 0 : i32
    return %c0_i32, %c0_i32_0 : i32, i32
  }
  func.func @transform_4(%arg0: i32) -> (i32, i32) {
    %c0_i32 = arith.constant 0 : i32
    %c0_i32_0 = arith.constant 0 : i32
    %c0_i32_1 = arith.constant 0 : i32
    return %c0_i32, %c0_i32_0 : i32, i32
  }
  func.func @transform_5(%arg0: i32) -> (i32, i32) {
    %c0_i32 = arith.constant 0 : i32
    %c0_i32_0 = arith.constant 0 : i32
    %c0_i32_1 = arith.constant 0 : i32
    return %c0_i32, %c0_i32_0 : i32, i32
  }
  func.func @transform_6(%arg0: i32) -> (i32, i32) {
    %c0_i32 = arith.constant 0 : i32
    %c0_i32_0 = arith.constant 0 : i32
    %c0_i32_1 = arith.constant 0 : i32
    return %c0_i32, %c0_i32_0 : i32, i32
  }
  func.func @transform_7(%arg0: i32) -> (i32, i32) {
    %c0_i32 = arith.constant 0 : i32
    %c0_i32_0 = arith.constant 0 : i32
    return %arg0, %c0_i32 : i32, i32
  }
}

</mosaic_0001>

<bundles_post_ra>
// kernel: tpu_custom_call.1
= control target key start
LH: loop header
LB: loop body
LE: loop exit
PB: predicated region body
PF: predicated region fallthrough
CT: control target
= control target key end

     0   :  { %s679_s24 = smov 0   ;;  %s741_s0 = inlined_call_operand.vmem [shape: f32[32,16], index: 0, kind: input, shape index: {}]   ;;  %s742_s1 = inlined_call_operand.vmem [shape: f32[32,16], index: 1, kind: input, shape index: {}]   ;;  %s743_s2 = inlined_call_operand.vmem [shape: f32[32,16], index: 2, kind: input, shape index: {}]   ;;  %s744_s3 = inlined_call_operand.vmem [shape: f32[16,32], index: 3, kind: input, shape index: {}]   ;;  %s745_s4 = inlined_call_operand.vmem [shape: f32[16,32], index: 4, kind: input, shape index: {}]   ;;  %s746_s5 = inlined_call_operand.vmem [shape: f32[1,32], index: 5, kind: input, shape index: {}]   ;;  %s747_s6 = inlined_call_operand.vmem [shape: f32[32,1], index: 6, kind: input, shape index: {}]   ;;  %s748_s7 = inlined_call_operand.vmem [shape: f32[32,2], index: 7, kind: output, shape index: {}]  }
   0x1 LB: > { %s593_s25 = sadd.s32 4294967295, %s636_s24   ;;  %p597_p0 = scmp.ge.s32.totalorder %s636_s24, 1  ;;  %s636_s24 = sphi %s679_s24, %s17_s24  }
   0x2   : > { %p260_p1 = scmp.lt.s32.totalorder %s636_s24, 3 }
   0x4   : > { %p261_p2 = pnand %p597_p0, %p260_p1 }
   0x5   : > { %s598_s9 = sshll.u32 (!%p261_p2), %s593_s25, 1  ;;  %s638_s10 = smov (!%p261_p2), 1  }
   0x6   : > { %264 = sbr.rel (%p261_p2) target bundleno = 404 (0x194), region = 48  ;;  %p303_p3 = scmp.lt.s32.totalorder (!%p261_p2), %s598_s9, 3 }
   0xb   : > { %v335_v0 = vld [vmem:[%s745_s4 + $0x8] sm:$0xff]  ;;  %v334_v2 = vld [vmem:[%s745_s4] sm:$0xff]  ;;  %s750_s9 = smov (!%p303_p3, %s598_s9), 3  ;;  %vm341_vm0 = vcmask 130048   ;;  %v340_v10 = vld [vmem:[%s747_s6 + $0x18] sm:$0xff]  ;;  %vm440_vm1 = vcmask 261120  }
   0xc   : > { %v333_v1 = vld [vmem:[%s744_s3 + $0x8] sm:$0xff]  ;;  %618 = vmatpush.msra.mxu1 %v335_v0  ;;  %v332_v3 = vld [vmem:[%s744_s3] sm:$0xff]  ;;  %362 = vmatpush.msra.mxu0 %v335_v0  ;;  %s699_s12 = sshll.u32 %s750_s9, 3  ;;  %v339_v11 = vld [vmem:[%s747_s6 + $0x10] sm:$0xff]  ;;  %vm499_vm2 = vcmask 7168   ;;  %vm510_vm3 = vcmask 15368  }
   0xd   : > { %423 = vmatpush.msra.mxu2 %v333_v1  ;;  %s312_s15 = scalar_lea.vmem %s742_s1, %s699_s12  ;;  %s306_s18 = scalar_lea.vmem %s741_s0, %s699_s12  ;;  %459 = vmatpush.msra.mxu3 %v340_v10  ;;  %v338_v12 = vld [vmem:[%s747_s6 + $0x8] sm:$0xff]  ;;  %v337_v13 = vld [vmem:[%s747_s6] sm:$0xff] }
   0xe   : > { %619 = vmatpush.msra.mxu1 %v334_v2  ;;  %363 = vmatpush.msra.mxu0 %v334_v2  ;;  %v329_v4 = vld [vmem:[%s312_s15 + $0x8] sm:$0xff]  ;;  %v326_v5 = vld [vmem:[%s306_s18] sm:$0xff]  ;;  %s318_s21 = scalar_lea.vmem %s743_s2, %s699_s12  ;;  %s324_s14 = scalar_lea.vmem %s748_s7, %s699_s12 }
   0xf   : > { %424 = vmatpush.msra.mxu2 %v332_v3  ;;  %v328_v6 = vld [vmem:[%s312_s15] sm:$0xff]  ;;  %607 = vmatmul.msk.f32.vlgmr.msra.gmra.mxu1 %vm341_vm0, %v329_v4  ;;  %v327_v8 = vld [vmem:[%s306_s18 + $0x8] sm:$0xff] }
  0x10   : > { %391 = vmatpush.msrb.mxu1 %v335_v0  ;;  %610 = vmatmul.msk.f32.vlgmr.msra.gmra.mxu2 %vm341_vm0, %v326_v5  ;;  %v330_v7 = vld [vmem:[%s318_s21] sm:$0xff]  ;;  %v331_v9 = vld [vmem:[%s318_s21 + $0x8] sm:$0xff] }
  0x11   : > { %606 = vmatmul.msk.f32.vlgmr.msra.gmra.mxu0 %vm341_vm0, %v328_v6  ;;  %460 = vmatpush.msra.mxu3 %v339_v11  ;;  %v629_v15 = vld [vmem:[%s746_s5] ss:$0 sm:$0xff] }
  0x12   : > { %392 = vmatpush.msrb.mxu1 %v334_v2  ;;  %488 = vmatpush.msrb.mxu0 %v340_v10 }
  0x13   : > { %461 = vmatpush.msra.mxu3 %v338_v12 }
  0x14   : > { %489 = vmatpush.msrb.mxu0 %v339_v11 }
  0x15   : > { %462 = vmatpush.msra.mxu3 %v337_v13 }
  0x16   : > { %490 = vmatpush.msrb.mxu0 %v338_v12 }
  0x17   : > { %608 = vmatmul.msk.f32.vlgmr.msrb.gmra.mxu1 %vm341_vm0, %v330_v7 }
  0x18   : > { %611 = vmatmul.msk.f32.gmra.mxu2 %vm341_vm0, %v327_v8  ;;  %491 = vmatpush.msrb.mxu0 %v337_v13 }
  0x1f   : > { %609 = vmatmul.msk.f32.gmra.mxu1 %vm341_vm0, %v331_v9 }
  0x8c   : > { %v368_v14 = vpop.f32.mrf.mxu1 }
  0x8e   : > { %v365_v17 = vpop.f32.mrf.mxu0 }
  0x93   : > { %v426_v16 = vpop.f32.mrf.mxu2 }
  0x94   : > { %v427_v18 = vadd.f32 %v629_v15, %v426_v16  ;;  %v394_v19 = vpop.f32.mrf.mxu1 }
  0x96   : > { %v432_v20 = vadd.f32 %v427_v18, %v365_v17  ;;  %v436_v21 = vadd.f32 %v427_v18, %v394_v19 }
  0x98   : > { %v434_v22 = vmax.f32 %v432_v20, 0.0  ;;  %v438_v23 = vmax.f32 %v436_v21, 0.0 }
  0x9a   : > { %612 = vmatmul.msk.f32.vlgmr.msra.gmra.mxu3 %vm440_vm1, %v434_v22  ;;  %614 = vmatmul.msk.f32.vlgmr.msrb.gmra.mxu0 %vm440_vm1, %v438_v23 }
  0x9b   : > { %v429_v24 = vpop.f32.mrf.mxu2 }
  0x9c   : > { %v430_v25 = vadd.f32 %v629_v15, %v429_v24  ;;  %v397_v26 = vpop.f32.mrf.mxu1 }
  0x9e   : > { %v433_v27 = vadd.f32 %v430_v25, %v368_v14  ;;  %v437_v28 = vadd.f32 %v430_v25, %v397_v26 }
  0xa0   : > { %v435_v29 = vmax.f32 %v433_v27, 0.0  ;;  %v439_v30 = vmax.f32 %v437_v28, 0.0 }
  0xa2   : > { %613 = vmatmul.msk.f32.gmra.mxu3 %vm440_vm1, %v435_v29  ;;  %615 = vmatmul.msk.f32.gmra.mxu0 %vm440_vm1, %v439_v30 }
 0x117   : > { %v493_v31 = vpop.f32.mrf.mxu0 }
 0x118   : > { %504 = vrot.lane.b32.xlu0 %v493_v31, %s638_s10 }
 0x11d   : > { %v464_v32 = vpop.f32.mrf.mxu3 }
 0x11e   : > { %500 = vst.msk [vmem:[%s324_s14] sm:$0xff] %vm499_vm2, %v464_v32 }
 0x11f   : > { %v496_v33 = vpop.f32.mrf.mxu0 }
 0x120   : > { %506 = vrot.lane.b32.xlu0 %v496_v33, %s638_s10 }
 0x125   : > { %v467_v34 = vpop.f32.mrf.mxu3 }
 0x126   : > { %501 = vst.msk [vmem:[%s324_s14 + $0x8] sm:$0xff] %vm499_vm2, %v467_v34 }
 0x18a   : > { %v505_v35 = vpop.permute.xlu0 %504 }
 0x18b   : > { %511 = vst.msk [vmem:[%s324_s14] sm:$0xff] %vm510_vm3, %v505_v35 }
 0x192   : > { %v507_v36 = vpop.permute.xlu0 %506 }
 0x193   : > { %512 = vst.msk [vmem:[%s324_s14 + $0x8] sm:$0xff] %vm510_vm3, %v507_v36 }
 0x194 PF: > { %s17_s24 = sadd.s32 1, %s636_s24  }
 0x195   : > { %p14_p4 = scmp.ge.s32.totalorder %s17_s24, 4  }
 0x197   :  { %16 = sbr.rel (!%p14_p4) target bundleno = 1 (0x1), region = 84 }

// kernel: tpu_custom_call.1
= control target key start
LH: loop header
LB: loop body
LE: loop exit
PB: predicated region body
PF: predicated region fallthrough
CT: control target
= control target key end

     0   :  { %s679_s24 = smov 0   ;;  %s741_s0 = inlined_call_operand.vmem [shape: f32[32,16], index: 0, kind: input, shape index: {}]   ;;  %s742_s1 = inlined_call_operand.vmem [shape: f32[32,16], index: 1, kind: input, shape index: {}]   ;;  %s743_s2 = inlined_call_operand.vmem [shape: f32[32,16], index: 2, kind: input, shape index: {}]   ;;  %s744_s3 = inlined_call_operand.vmem [shape: f32[16,32], index: 3, kind: input, shape index: {}]   ;;  %s745_s4 = inlined_call_operand.vmem [shape: f32[16,32], index: 4, kind: input, shape index: {}]   ;;  %s746_s5 = inlined_call_operand.vmem [shape: f32[1,32], index: 5, kind: input, shape index: {}]   ;;  %s747_s6 = inlined_call_operand.vmem [shape: f32[32,1], index: 6, kind: input, shape index: {}]   ;;  %s748_s7 = inlined_call_operand.vmem [shape: f32[32,2], index: 7, kind: output, shape index: {}]  }
   0x1 LB: > { %s593_s25 = sadd.s32 4294967295, %s636_s24   ;;  %p597_p0 = scmp.ge.s32.totalorder %s636_s24, 1  ;;  %s636_s24 = sphi %s679_s24, %s17_s24  }
   0x2   : > { %p260_p1 = scmp.lt.s32.totalorder %s636_s24, 3 }
   0x4   : > { %p261_p2 = pnand %p597_p0, %p260_p1 }
   0x5   : > { %s598_s9 = sshll.u32 (!%p261_p2), %s593_s25, 1  ;;  %s638_s10 = smov (!%p261_p2), 1  }
   0x6   : > { %264 = sbr.rel (%p261_p2) target bundleno = 404 (0x194), region = 48  ;;  %p303_p3 = scmp.lt.s32.totalorder (!%p261_p2), %s598_s9, 3 }
   0xb   : > { %v335_v0 = vld [vmem:[%s745_s4 + $0x8] sm:$0xff]  ;;  %v334_v2 = vld [vmem:[%s745_s4] sm:$0xff]  ;;  %s750_s9 = smov (!%p303_p3, %s598_s9), 3  ;;  %vm341_vm0 = vcmask 130048   ;;  %v340_v10 = vld [vmem:[%s747_s6 + $0x18] sm:$0xff]  ;;  %vm440_vm1 = vcmask 261120  }
   0xc   : > { %v333_v1 = vld [vmem:[%s744_s3 + $0x8] sm:$0xff]  ;;  %618 = vmatpush.msra.mxu1 %v335_v0  ;;  %v332_v3 = vld [vmem:[%s744_s3] sm:$0xff]  ;;  %362 = vmatpush.msra.mxu0 %v335_v0  ;;  %s699_s12 = sshll.u32 %s750_s9, 3  ;;  %v339_v11 = vld [vmem:[%s747_s6 + $0x10] sm:$0xff]  ;;  %vm499_vm2 = vcmask 7168   ;;  %vm510_vm3 = vcmask 15368  }
   0xd   : > { %423 = vmatpush.msra.mxu2 %v333_v1  ;;  %s312_s15 = scalar_lea.vmem %s742_s1, %s699_s12  ;;  %s306_s18 = scalar_lea.vmem %s741_s0, %s699_s12  ;;  %459 = vmatpush.msra.mxu3 %v340_v10  ;;  %v338_v12 = vld [vmem:[%s747_s6 + $0x8] sm:$0xff]  ;;  %v337_v13 = vld [vmem:[%s747_s6] sm:$0xff] }
   0xe   : > { %619 = vmatpush.msra.mxu1 %v334_v2  ;;  %363 = vmatpush.msra.mxu0 %v334_v2  ;;  %v329_v4 = vld [vmem:[%s312_s15 + $0x8] sm:$0xff]  ;;  %v326_v5 = vld [vmem:[%s306_s18] sm:$0xff]  ;;  %s318_s21 = scalar_lea.vmem %s743_s2, %s699_s12  ;;  %s324_s14 = scalar_lea.vmem %s748_s7, %s699_s12 }
   0xf   : > { %424 = vmatpush.msra.mxu2 %v332_v3  ;;  %v328_v6 = vld [vmem:[%s312_s15] sm:$0xff]  ;;  %607 = vmatmul.msk.f32.vlgmr.msra.gmra.mxu1 %vm341_vm0, %v329_v4  ;;  %v327_v8 = vld [vmem:[%s306_s18 + $0x8] sm:$0xff] }
  0x10   : > { %391 = vmatpush.msrb.mxu1 %v335_v0  ;;  %610 = vmatmul.msk.f32.vlgmr.msra.gmra.mxu2 %vm341_vm0, %v326_v5  ;;  %v330_v7 = vld [vmem:[%s318_s21] sm:$0xff]  ;;  %v331_v9 = vld [vmem:[%s318_s21 + $0x8] sm:$0xff] }
  0x11   : > { %606 = vmatmul.msk.f32.vlgmr.msra.gmra.mxu0 %vm341_vm0, %v328_v6  ;;  %460 = vmatpush.msra.mxu3 %v339_v11  ;;  %v629_v15 = vld [vmem:[%s746_s5] ss:$0 sm:$0xff] }
  0x12   : > { %392 = vmatpush.msrb.mxu1 %v334_v2  ;;  %488 = vmatpush.msrb.mxu0 %v340_v10 }
  0x13   : > { %461 = vmatpush.msra.mxu3 %v338_v12 }
  0x14   : > { %489 = vmatpush.msrb.mxu0 %v339_v11 }
  0x15   : > { %462 = vmatpush.msra.mxu3 %v337_v13 }
  0x16   : > { %490 = vmatpush.msrb.mxu0 %v338_v12 }
  0x17   : > { %608 = vmatmul.msk.f32.vlgmr.msrb.gmra.mxu1 %vm341_vm0, %v330_v7 }
  0x18   : > { %611 = vmatmul.msk.f32.gmra.mxu2 %vm341_vm0, %v327_v8  ;;  %491 = vmatpush.msrb.mxu0 %v337_v13 }
  0x1f   : > { %609 = vmatmul.msk.f32.gmra.mxu1 %vm341_vm0, %v331_v9 }
  0x8c   : > { %v368_v14 = vpop.f32.mrf.mxu1 }
  0x8e   : > { %v365_v17 = vpop.f32.mrf.mxu0 }
  0x93   : > { %v426_v16 = vpop.f32.mrf.mxu2 }
  0x94   : > { %v427_v18 = vadd.f32 %v629_v15, %v426_v16  ;;  %v394_v19 = vpop.f32.mrf.mxu1 }
  0x96   : > { %v432_v20 = vadd.f32 %v427_v18, %v365_v17  ;;  %v436_v21 = vadd.f32 %v427_v18, %v394_v19 }
  0x98   : > { %v434_v22 = vmax.f32 %v432_v20, 0.0  ;;  %v438_v23 = vmax.f32 %v436_v21, 0.0 }
  0x9a   : > { %612 = vmatmul.msk.f32.vlgmr.msra.gmra.mxu3 %vm440_vm1, %v434_v22  ;;  %614 = vmatmul.msk.f32.vlgmr.msrb.gmra.mxu0 %vm440_vm1, %v438_v23 }
  0x9b   : > { %v429_v24 = vpop.f32.mrf.mxu2 }
  0x9c   : > { %v430_v25 = vadd.f32 %v629_v15, %v429_v24  ;;  %v397_v26 = vpop.f32.mrf.mxu1 }
  0x9e   : > { %v433_v27 = vadd.f32 %v430_v25, %v368_v14  ;;  %v437_v28 = vadd.f32 %v430_v25, %v397_v26 }
  0xa0   : > { %v435_v29 = vmax.f32 %v433_v27, 0.0  ;;  %v439_v30 = vmax.f32 %v437_v28, 0.0 }
  0xa2   : > { %613 = vmatmul.msk.f32.gmra.mxu3 %vm440_vm1, %v435_v29  ;;  %615 = vmatmul.msk.f32.gmra.mxu0 %vm440_vm1, %v439_v30 }
 0x117   : > { %v493_v31 = vpop.f32.mrf.mxu0 }
 0x118   : > { %504 = vrot.lane.b32.xlu0 %v493_v31, %s638_s10 }
 0x11d   : > { %v464_v32 = vpop.f32.mrf.mxu3 }
 0x11e   : > { %500 = vst.msk [vmem:[%s324_s14] sm:$0xff] %vm499_vm2, %v464_v32 }
 0x11f   : > { %v496_v33 = vpop.f32.mrf.mxu0 }
 0x120   : > { %506 = vrot.lane.b32.xlu0 %v496_v33, %s638_s10 }
 0x125   : > { %v467_v34 = vpop.f32.mrf.mxu3 }
 0x126   : > { %501 = vst.msk [vmem:[%s324_s14 + $0x8] sm:$0xff] %vm499_vm2, %v467_v34 }
 0x18a   : > { %v505_v35 = vpop.permute.xlu0 %504 }
 0x18b   : > { %511 = vst.msk [vmem:[%s324_s14] sm:$0xff] %vm510_vm3, %v505_v35 }
 0x192   : > { %v507_v36 = vpop.permute.xlu0 %506 }
 0x193   : > { %512 = vst.msk [vmem:[%s324_s14 + $0x8] sm:$0xff] %vm510_vm3, %v507_v36 }
 0x194 PF: > { %s17_s24 = sadd.s32 1, %s636_s24  }
 0x195   : > { %p14_p4 = scmp.ge.s32.totalorder %s17_s24, 4  }
 0x197   :  { %16 = sbr.rel (!%p14_p4) target bundleno = 1 (0x1), region = 84 }

</bundles_post_ra>
